<compile_context>
chip_gen: v5e
topology: v5e:2x2
jax: 0.10.0
libtpu: 0.0.40
codegen_flags: <defaults>
</compile_context>

<pallas_src>
import functools

import numpy as np
import jax
import jax.numpy as jnp
from jax.experimental import pallas as pl
from jax.experimental.pallas import tpu as pltpu

EPS = 1e-8


def _round_up(x, m):
    return ((x + m - 1) // m) * m


def _cdiv(a, b):
    return -(-a // b)


def _vmem_capacity_bytes():
    """Physical VMEM per TensorCore; conservative fallback (v7x = 64 MiB)."""
    try:
        info = pltpu.get_tpu_info()
        cap = int(getattr(info, "vmem_capacity_bytes", 0))
        if cap > 0:
            return cap
    except Exception:
        pass
    return 64 * 1024 * 1024


def _pick_row_tile(D):
    """Row tile for the precompute kernel (bounds its live set at large D)."""
    for tr in (512, 256, 128):
        if D > tr and D % tr == 0:
            return tr
    return D


def _pick_tile_b(B, Rp, D, Wp, budget_bytes):
    """Largest image-batch tile whose live working set fits the VMEM budget.

    Assumes the img tile / dlw_t / diag are single-buffered (pl.Buffered(1))."""
    # per image row: img f32 tile + in-kernel bf16 copy + (Rp, Wp) attention maps
    # (scores / attn / e) + the (Wp, D) intermediates (ctx / sim_loc / sub / temps
    # + the bf16 cast fed to the dominant matmul).
    per_b = Rp * D * (4 + 2) + 3 * Rp * Wp * 4 + 5 * Wp * D * 4 + Wp * D * 2
    # fixed: caption tile (double-buffered) + dlw_t (bf16, single) + diag + slack for
    # compiler-internal scratch.
    fixed = 2 * Wp * D * 4 + D * D * 2 + D * 4 + (2 << 20)
    tb = max(1, (budget_bytes - fixed) // per_b)
    tb = int(min(B, tb))
    # v7x megacore: prefer an even number of image tiles (>= 2) so the two
    # TensorCores split the parallel batch axis evenly.
    if B >= 16 and tb > 8:
        nb = _cdiv(B, tb)
        if nb == 1:
            nb = 2
        elif nb % 2:
            nb += 1
        tb = min(tb, _cdiv(B, nb))
    # lane-dense (1, TB) output stores when big; sublane-friendly otherwise.
    if tb >= 128:
        tb = (tb // 128) * 128
    elif tb >= 8:
        tb = (tb // 8) * 8
    return max(1, tb)


# ----------------------------------------------------------------------------
# Kernel 1: Dim_learned_weights.T (D, D) [bf16] and Diagonal (1, D) [f32]
#   Row-tiled over the weight table so the live set stays bounded for large D.
# ----------------------------------------------------------------------------
def precompute_kernel(w_emb_ref, sim_map_ref, exp_tl_ref, dlw_t_ref, diag_ref):
    w = jax.nn.sigmoid(w_emb_ref[...])                       # (TR, D) rows of "weights"
    d = w.shape[1]
    mean = jnp.mean(w, axis=1, keepdims=True)                # (TR, 1)
    var = jnp.sum((w - mean) ** 2, axis=1, keepdims=True) / (d - 1)  # unbiased (torch.std)
    thres = mean + sim_map_ref[...] * jnp.sqrt(var)          # (TR, 1)
    values = exp_tl_ref[0] * (w - thres)                     # exp(temp_learnable)*(w-thres)
    mask_probability = jnp.tanh(jnp.exp(values))
    dlw = mask_probability * w
    inv = 1.0 / (jnp.sqrt(jnp.sum(dlw * dlw, axis=1, keepdims=True)) + EPS)
    dlw = dlw * inv                                          # l2norm over dim 1 (f32)

    # Rows of Dim_learned_weights become columns of the transposed, MXU-ready copy.
    dlw_t_ref[...] = jnp.transpose(dlw).astype(jnp.bfloat16)

    @pl.when(pl.program_id(0) == 0)
    def _():
        diag_ref[...] = jnp.zeros_like(diag_ref)
    diag_ref[...] += jnp.sum(dlw, axis=0, keepdims=True)     # Diagonal (1, D), f32


def compute_dim_learned_weights(w_emb, sim_map_w, temp_learn_w, vmem_limit):
    D = w_emb.shape[0]
    TR = _pick_row_tile(D)
    exp_tl = jnp.exp(temp_learn_w.astype(jnp.float32).reshape(-1)[:1])   # (1,) SMEM scalar
    dlw_t, diag = pl.pallas_call(
        precompute_kernel,
        out_shape=(jax.ShapeDtypeStruct((D, D), jnp.bfloat16),
                   jax.ShapeDtypeStruct((1, D), jnp.float32)),
        grid_spec=pltpu.PrefetchScalarGridSpec(
            num_scalar_prefetch=0,
            grid=(D // TR,),
            in_specs=[
                pl.BlockSpec((TR, D), lambda r: (r, 0)),                 # weight rows
                pl.BlockSpec((TR, 1), lambda r: (r, 0)),                 # sim_map rows
                pl.BlockSpec(memory_space=pltpu.MemorySpace.SMEM),       # exp(temp_learn)
            ],
            out_specs=(
                pl.BlockSpec((D, TR), lambda r: (0, r)),   # Dim_learned_weights.T (bf16)
                pl.BlockSpec((1, D), lambda r: (0, 0)),    # Diagonal accumulator (f32)
            ),
        ),
        compiler_params=pltpu.CompilerParams(
            dimension_semantics=("arbitrary",),
            vmem_limit_bytes=vmem_limit,
        ),
    )(w_emb, sim_map_w.reshape(D, 1), exp_tl)
    return dlw_t, diag


# ----------------------------------------------------------------------------
# Kernel 2: per-(image-tile, caption) similarity
#   grid = (n_img_tiles, n_caption); image tile outer (stays resident),
#   caption block inner (small, streams).
# ----------------------------------------------------------------------------
def sim_kernel(lens_ref, img_ref, cap_ref, diag_ref, dlwt_ref, smooth_ref, out_ref,
               *, n_regions):
    ci = pl.program_id(1)                                    # caption index (inner axis)
    n_word = lens_ref[ci]                                    # int32 scalar (SMEM)
    denom = jnp.maximum(n_word, 1)                           # guard zero-length captions

    img = img_ref[...]                                       # (TB, Rp, D) f32
    cap = cap_ref[0]                                         # (Wp, D)     f32
    diag = diag_ref[...]                                     # (1, D)      f32
    dlw_t = dlwt_ref[...]                                    # (D, D)      bf16 (W.T)
    smooth = smooth_ref[0]                                   # exp(temp_scale), SMEM scalar

    TB, Rp, D = img.shape
    Wp = cap.shape[0]

    img_bf16 = img.astype(jnp.bfloat16)                      # feeds the bf16 ctx matmul

    # mask over padded words
    word_ids = jax.lax.broadcasted_iota(jnp.int32, (1, Wp), 1)
    wmask2 = word_ids < n_word                                # (1, Wp)
    wmask3 = wmask2[:, None, :]                               # (1, 1, Wp)

    # query @ Diagonal_Mask == row scale by Diagonal
    q = cap * diag                                            # (Wp, D)

    # scores[b,r,w] = q[w,:] . img[b,r,:]  (f32 MXU; Rp % 8 == 0 -> reshapes are views)
    scores = jax.lax.dot_general(img.reshape(TB * Rp, D), q,
                                 (((1,), (1,)), ((), ())),
                                 preferred_element_type=jnp.float32)    # (TB*Rp, Wp)
    attn = jnp.tanh(scores).reshape(TB, Rp, Wp)
    attn = jnp.where(attn >= 0, attn, 0.1 * attn)             # LeakyReLU(0.1)
    attn = jnp.where(wmask3, attn, 0.0)                       # drop padded words
    # l2norm over the word axis (per (b, r)); EUP reciprocal, tiny error, |attn| <= ~1.
    inv_wn = pl.reciprocal(
        jnp.sqrt(jnp.sum(attn * attn, axis=2, keepdims=True)) + EPS, approx=True)
    attn = attn * inv_wn

    # softmax over regions; max-subtract dropped: |attn| <= 1 after the word l2norm,
    # so |logit| <= smooth (~14.3) and exp is safe in f32.
    e = jnp.exp(attn * smooth)
    if Rp != n_regions:
        region_ids = jax.lax.broadcasted_iota(jnp.int32, (1, Rp, 1), 1)
        e = jnp.where(region_ids < n_regions, e, 0.0)          # exact pad-region mask
    attn = e * pl.reciprocal(jnp.sum(e, axis=1, keepdims=True), approx=True)

    # Context_img = l2norm(bmm(attn, img)): bf16 operands, f32 accumulate; the l2norm
    # cancels the (uniform per-(b,w)) scale error, so bf16 is numerically safe here.
    ctx = jax.lax.dot_general(attn.astype(jnp.bfloat16), img_bf16,
                              (((1,), (1,)), ((0,), (0,))),
                              preferred_element_type=jnp.float32)       # (TB, Wp, D)
    inv_cn = pl.reciprocal(
        jnp.sqrt(jnp.sum(ctx * ctx, axis=2, keepdims=True)) + EPS, approx=True)
    ctx = ctx * inv_cn

    sim_loc = ctx * cap[None, :, :]                            # (TB, Wp, D) f32

    # Dominant matmul: (TB*Wp, D) @ (D, D) in bf16 on the MXU, f32 accumulate.
    sub = jax.lax.dot_general(sim_loc.reshape(TB * Wp, D).astype(jnp.bfloat16),
                              dlw_t, (((1,), (0,)), ((), ())),
                              preferred_element_type=jnp.float32)
    sub = sub.reshape(TB, Wp, D)

    # Fused l2norm + row-sum:
    #   sum_e l2norm(sim_sub)[b,w,e] == (sim_loc[b,w,:] . Diagonal) / (||sim_sub[b,w,:]|| + eps)
    rownorm = jnp.sqrt(jnp.sum(sub * sub, axis=2))             # (TB, Wp)
    rowsum = jnp.sum(sim_loc * diag[None, :, :], axis=2)       # (TB, Wp), f32 numerator
    sim_vec = rowsum * pl.reciprocal(rownorm + EPS, approx=True)
    sim_vec = jnp.where(wmask2, sim_vec, 0.0)                  # only real words

    sim = jnp.sum(sim_vec, axis=1) * (1.0 / denom.astype(jnp.float32))
    out_ref[...] = sim.reshape(1, TB)


# ----------------------------------------------------------------------------
# Wrapper
# ----------------------------------------------------------------------------
def sim_vec_forward(img_emb, cap_emb, cap_lens, w_emb, sim_map_w,
                    temp_scale_w, temp_learn_w, tile_b=None):
    B, R, D = img_emb.shape
    n_caption, Wmax, _ = cap_emb.shape

    vmem_cap = _vmem_capacity_bytes()
    vmem_limit = int(min(vmem_cap * 0.85, 112 * 1024 * 1024))

    dlw_t, diag = compute_dim_learned_weights(w_emb, sim_map_w, temp_learn_w, vmem_limit)
    smooth = jnp.exp(temp_scale_w.astype(jnp.float32).reshape(-1)[:1])   # (1,) SMEM scalar

    # Pad word & region axes to sublane multiples; padded entries are masked in-kernel.
    # Region padding keeps the in-kernel (TB,Rp,D)<->(TB*Rp,D) reshapes relayout-free.
    Wp = max(8, _round_up(Wmax, 8))
    if Wp != Wmax:
        cap_emb = jnp.pad(cap_emb, ((0, 0), (0, Wp - Wmax), (0, 0)))
    Rp = max(8, _round_up(R, 8))
    if Rp != R:
        img_emb = jnp.pad(img_emb, ((0, 0), (0, Rp - R), (0, 0)))

    # Image-batch tiling (generation aware: sized from physical per-core VMEM).
    if tile_b is None:
        tile_b = _pick_tile_b(B, Rp, D, Wp, int(vmem_cap * 0.6))
    TB = int(max(1, min(tile_b, B)))
    Bp = _round_up(B, TB)
    if Bp != B:
        img_emb = jnp.pad(img_emb, ((0, Bp - B), (0, 0), (0, 0)))
    n_btiles = Bp // TB

    kernel = functools.partial(sim_kernel, n_regions=R)

    def make_call(single_buffer):
        def inv_spec(shape, index_map):
            # Inputs constant along the inner caption axis: one VMEM buffer is enough;
            # the only cost is one exposed DMA per outer (image-tile) step.
            if single_buffer:
                return pl.BlockSpec(shape, index_map, pipeline_mode=pl.Buffered(1))
            return pl.BlockSpec(shape, index_map)

        return pl.pallas_call(
            kernel,
            out_shape=jax.ShapeDtypeStruct((n_caption, Bp), jnp.float32),
            grid_spec=pltpu.PrefetchScalarGridSpec(
                num_scalar_prefetch=1,
                grid=(n_btiles, n_caption),                   # img tile outer, caption inner
                in_specs=[
                    inv_spec((TB, Rp, D), lambda j, i, lens: (j, 0, 0)),    # img tile
                    pl.BlockSpec((1, Wp, D), lambda j, i, lens: (i, 0, 0)), # caption block
                    inv_spec((1, D), lambda j, i, lens: (0, 0)),            # Diagonal (f32)
                    inv_spec((D, D), lambda j, i, lens: (0, 0)),            # dlw_t (bf16)
                    pl.BlockSpec(memory_space=pltpu.MemorySpace.SMEM),      # exp(temp_scale)
                ],
                out_specs=pl.BlockSpec((1, TB), lambda j, i, lens: (i, j)),
            ),
            compiler_params=pltpu.CompilerParams(
                dimension_semantics=("parallel", "parallel"),
                vmem_limit_bytes=vmem_limit,
            ),
        )

    args = (cap_lens, img_emb, cap_emb, diag, dlw_t, smooth)
    if hasattr(pl, "Buffered"):
        try:
            out = jax.block_until_ready(make_call(True)(*args))
        except Exception:
            # Buffered(1) rejected on this jax/libtpu -> default double buffering.
            out = make_call(False)(*args)
    else:
        out = make_call(False)(*args)

    return out[:, :B].T                                       # (n_image, n_caption)


# ----------------------------------------------------------------------------
# Pure-JAX reference (mirrors the PyTorch forward exactly, f32 HIGHEST)
# ----------------------------------------------------------------------------
def reference_forward(img_emb, cap_emb, cap_lens, w_emb, sim_map_w,
                      temp_scale_w, temp_learn_w):
    hi = jax.lax.Precision.HIGHEST
    w = jax.nn.sigmoid(w_emb)
    mean = w.mean(1)
    std = jnp.std(w, axis=1, ddof=1)
    thres = mean + sim_map_w[0] * std
    values = jnp.exp(temp_learn_w[0, 0]) * (w - thres[:, None])
    maskp = jnp.tanh(jnp.exp(values))
    dlw = maskp * w
    dlw = dlw / (jnp.sqrt((dlw ** 2).sum(1, keepdims=True)) + EPS)
    diag = dlw.sum(0)
    smooth = jnp.exp(temp_scale_w[0, 0])

    sims = []
    for i in range(cap_emb.shape[0]):
        nw = int(cap_lens[i])
        cap_i = cap_emb[i, :nw, :]
        q = cap_i * diag[None, :]
        attn = jnp.tanh(jnp.einsum('wd,brd->bwr', q, img_emb, precision=hi))
        attn = jnp.where(attn >= 0, attn, 0.1 * attn)
        attn = attn / (jnp.sqrt((attn ** 2).sum(1, keepdims=True)) + EPS)   # l2norm over words
        attn = jax.nn.softmax(attn * smooth, axis=2)                        # over regions
        ctx = jnp.einsum('bwr,brd->bwd', attn, img_emb, precision=hi)
        ctx = ctx / (jnp.sqrt((ctx ** 2).sum(-1, keepdims=True)) + EPS)
        sim_loc = ctx * cap_i[None]
        ss = jnp.einsum('bwd,ed->bwe', sim_loc, dlw, precision=hi)
        ss = ss / (jnp.sqrt((ss ** 2).sum(-1, keepdims=True)) + EPS)
        sims.append(ss.sum(-1).mean(1, keepdims=True))
    return jnp.concatenate(sims, axis=1)


# ----------------------------------------------------------------------------
if __name__ == "__main__":
    n_image, n_regions, D = 4, 6, 32        # n_regions=6 exercises the region-padding path
    n_caption, max_words = 3, 7             # max_words=7 exercises the word-padding path

    key = jax.random.PRNGKey(0)
    k1, k2, k3, k4 = jax.random.split(key, 4)

    # module parameters (deterministic, matching the torch init scheme)
    w_emb = jax.random.normal(k1, (D, D), dtype=jnp.float32)          # nn.Embedding ~ N(0,1)
    sim_map_w = 2.5 + 0.1 * jax.random.normal(k2, (1, D), dtype=jnp.float32)
    temp_scale_w = jnp.full((1, 1), np.log(1.0 / 0.07), dtype=jnp.float32)
    temp_learn_w = jnp.full((1, 1), 4.0, dtype=jnp.float32)
    # TODO(synk): self.sim_eval is never used in forward -> not materialized.

    img_emb = jax.random.normal(k3, (n_image, n_regions, D), dtype=jnp.float32)
    cap_emb = jax.random.normal(k4, (n_caption, max_words, D), dtype=jnp.float32)
    cap_lens = jnp.array([5, 7, 3], dtype=jnp.int32)

    # tile_b forced to 2 so the small example also exercises image-batch tiling.
    out = sim_vec_forward(img_emb, cap_emb, cap_lens, w_emb, sim_map_w,
                          temp_scale_w, temp_learn_w, tile_b=2)
    out = jax.block_until_ready(out)

    ref = reference_forward(img_emb, cap_emb, cap_lens, w_emb, sim_map_w,
                            temp_scale_w, temp_learn_w)
    assert out.shape == (n_image, n_caption)
    # bf16 MXU operands on the ctx + dominant matmuls -> tolerance loosened vs a pure
    # f32 version; the trailing l2norms keep the relative error well under this bound.
    np.testing.assert_allclose(np.asarray(out), np.asarray(ref),
                               rtol=4e-2, atol=4e-2)
    print("KERNEL_OK")
</pallas_src>

<mosaic_0001>
module attributes {stable_mosaic.version = 11 : i64} {
  func.func @precompute_kernel(%arg0: i32, %arg1: memref<32x32xf32, #tpu.memory_space<vmem>>, %arg2: memref<32x1xf32, #tpu.memory_space<vmem>>, %arg3: memref<1xf32, #tpu.memory_space<smem>>, %arg4: memref<32x32xbf16, #tpu.memory_space<vmem>>, %arg5: memref<1x32xf32, #tpu.memory_space<vmem>>) attributes {dimension_semantics = [#tpu.dimension_semantics<arbitrary>], iteration_bounds = array<i64: 1>, scalar_prefetch = 0 : i64, scratch_operands = 0 : i64, tpu.core_type = #tpu.core_type<tc>, window_params = [{transform_indices = @transform_0, window_bounds = array<i64: 32, 32>}, {transform_indices = @transform_1, window_bounds = array<i64: 32, 1>}, {transform_indices = @transform_2, window_bounds = array<i64: 1>}, {transform_indices = @transform_3, window_bounds = array<i64: 32, 32>}, {pipeline_mode = #tpu.pipeline_mode<synchronous>, transform_indices = @transform_4, window_bounds = array<i64: 1, 32>}]} {
    %c0 = arith.constant 0 : index
    %c0_0 = arith.constant 0 : index
    %0 = vector.load %arg1[%c0, %c0_0] : memref<32x32xf32, #tpu.memory_space<vmem>>, vector<32x32xf32>
    %1 = arith.negf %0 : vector<32x32xf32>
    %2 = math.exp %1 : vector<32x32xf32>
    %cst = arith.constant 1.000000e+00 : f32
    %3 = vector.broadcast %cst : f32 to vector<32x32xf32>
    %4 = arith.addf %3, %2 : vector<32x32xf32>
    %5 = arith.divf %3, %4 : vector<32x32xf32>
    %cst_1 = arith.constant dense<0.000000e+00> : vector<32xf32>
    %6 = vector.multi_reduction <add>, %5, %cst_1 [1] : vector<32x32xf32> to vector<32xf32>
    %7 = vector.shape_cast %6 : vector<32xf32> to vector<32x1xf32>
    %cst_2 = arith.constant 3.200000e+01 : f32
    %8 = vector.broadcast %cst_2 : f32 to vector<32x1xf32>
    %9 = arith.divf %7, %8 : vector<32x1xf32>
    %10 = vector.broadcast %9 : vector<32x1xf32> to vector<32x32xf32>
    %11 = arith.subf %5, %10 : vector<32x32xf32>
    %12 = arith.mulf %11, %11 : vector<32x32xf32>
    %cst_3 = arith.constant dense<0.000000e+00> : vector<32xf32>
    %13 = vector.multi_reduction <add>, %12, %cst_3 [1] : vector<32x32xf32> to vector<32xf32>
    %14 = vector.shape_cast %13 : vector<32xf32> to vector<32x1xf32>
    %cst_4 = arith.constant 3.100000e+01 : f32
    %15 = vector.broadcast %cst_4 : f32 to vector<32x1xf32>
    %16 = arith.divf %14, %15 : vector<32x1xf32>
    %c0_5 = arith.constant 0 : index
    %c0_6 = arith.constant 0 : index
    %17 = vector.load %arg2[%c0_5, %c0_6] : memref<32x1xf32, #tpu.memory_space<vmem>>, vector<32x1xf32>
    %18 = math.sqrt %16 : vector<32x1xf32>
    %19 = arith.mulf %17, %18 : vector<32x1xf32>
    %20 = arith.addf %9, %19 : vector<32x1xf32>
    %c0_7 = arith.constant 0 : index
    %21 = memref.load %arg3[%c0_7] : memref<1xf32, #tpu.memory_space<smem>>
    %22 = vector.broadcast %20 : vector<32x1xf32> to vector<32x32xf32>
    %23 = arith.subf %5, %22 : vector<32x32xf32>
    %24 = vector.broadcast %21 : f32 to vector<32x32xf32>
    %25 = arith.mulf %24, %23 : vector<32x32xf32>
    %26 = math.exp %25 : vector<32x32xf32>
    %27 = math.tanh %26 : vector<32x32xf32>
    %28 = arith.mulf %27, %5 : vector<32x32xf32>
    %29 = arith.mulf %28, %28 : vector<32x32xf32>
    %cst_8 = arith.constant dense<0.000000e+00> : vector<32xf32>
    %30 = vector.multi_reduction <add>, %29, %cst_8 [1] : vector<32x32xf32> to vector<32xf32>
    %31 = vector.shape_cast %30 : vector<32xf32> to vector<32x1xf32>
    %32 = math.sqrt %31 : vector<32x1xf32>
    %cst_9 = arith.constant 9.99999993E-9 : f32
    %33 = vector.broadcast %cst_9 : f32 to vector<32x1xf32>
    %34 = arith.addf %32, %33 : vector<32x1xf32>
    %cst_10 = arith.constant 1.000000e+00 : f32
    %35 = vector.broadcast %cst_10 : f32 to vector<32x1xf32>
    %36 = arith.divf %35, %34 : vector<32x1xf32>
    %37 = vector.broadcast %36 : vector<32x1xf32> to vector<32x32xf32>
    %38 = arith.mulf %28, %37 : vector<32x32xf32>
    %39 = tpu.transpose %38, [1, 0] : vector<32x32xf32> -> vector<32x32xf32>
    %40 = arith.truncf %39 : vector<32x32xf32> to vector<32x32xbf16>
    %c0_11 = arith.constant 0 : index
    %c0_12 = arith.constant 0 : index
    %41 = vector.load %arg4[%c0_11, %c0_12] : memref<32x32xbf16, #tpu.memory_space<vmem>>, vector<32x32xbf16>
    tpu.vector_store %arg4[%c0_11, %c0_12], %40 {strides = array<i32>} : memref<32x32xbf16, #tpu.memory_space<vmem>>, vector<32x32xbf16>,
    %c0_i32 = arith.constant 0 : i32
    %42 = arith.cmpi eq, %arg0, %c0_i32 : i32
    %43 = arith.extui %42 : i1 to i32
    %c0_i32_13 = arith.constant 0 : i32
    %44 = arith.cmpi ne, %43, %c0_i32_13 : i32
    scf.if %44 {
      %cst_19 = arith.constant 0.000000e+00 : f32
      %50 = vector.broadcast %cst_19 : f32 to vector<1x32xf32>
      %c0_20 = arith.constant 0 : index
      %c0_21 = arith.constant 0 : index
      %51 = vector.load %arg5[%c0_20, %c0_21] : memref<1x32xf32, #tpu.memory_space<vmem>>, vector<1x32xf32>
      tpu.vector_store %arg5[%c0_20, %c0_21], %50 {strides = array<i32>} : memref<1x32xf32, #tpu.memory_space<vmem>>, vector<1x32xf32>,
    } else {
    }
    %c0_14 = arith.constant 0 : index
    %c0_15 = arith.constant 0 : index
    %45 = vector.load %arg5[%c0_14, %c0_15] : memref<1x32xf32, #tpu.memory_space<vmem>>, vector<1x32xf32>
    %cst_16 = arith.constant dense<0.000000e+00> : vector<32xf32>
    %46 = vector.multi_reduction <add>, %38, %cst_16 [0] : vector<32x32xf32> to vector<32xf32>
    %47 = vector.shape_cast %46 : vector<32xf32> to vector<1x32xf32>
    %48 = arith.addf %45, %47 : vector<1x32xf32>
    %c0_17 = arith.constant 0 : index
    %c0_18 = arith.constant 0 : index
    %49 = vector.load %arg5[%c0_17, %c0_18] : memref<1x32xf32, #tpu.memory_space<vmem>>, vector<1x32xf32>
    tpu.vector_store %arg5[%c0_17, %c0_18], %48 {strides = array<i32>} : memref<1x32xf32, #tpu.memory_space<vmem>>, vector<1x32xf32>,
    return
  }
  func.func @transform_0(%arg0: i32) -> (i32, i32) {
    %c0_i32 = arith.constant 0 : i32
    %c0_i32_0 = arith.constant 0 : i32
    return %arg0, %c0_i32 : i32, i32
  }
  func.func @transform_1(%arg0: i32) -> (i32, i32) {
    %c0_i32 = arith.constant 0 : i32
    %c0_i32_0 = arith.constant 0 : i32
    return %arg0, %c0_i32 : i32, i32
  }
  func.func @transform_2(%arg0: i32) -> i32 {
    %c0_i32 = arith.constant 0 : i32
    %c0_i32_0 = arith.constant 0 : i32
    return %c0_i32 : i32
  }
  func.func @transform_3(%arg0: i32) -> (i32, i32) {
    %c0_i32 = arith.constant 0 : i32
    %c0_i32_0 = arith.constant 0 : i32
    return %c0_i32, %arg0 : i32, i32
  }
  func.func @transform_4(%arg0: i32) -> (i32, i32) {
    %c0_i32 = arith.constant 0 : i32
    %c0_i32_0 = arith.constant 0 : i32
    %c0_i32_1 = arith.constant 0 : i32
    return %c0_i32, %c0_i32_0 : i32, i32
  }
}

</mosaic_0001>

<bundles_post_ra>
// kernel: tpu_custom_call.1
= control target key start
LH: loop header
LB: loop body
LE: loop exit
PB: predicated region body
PF: predicated region fallthrough
CT: control target
= control target key end

     0   :  { %11 = vsyncpa [#allocation4], 0  ;;  %s817_s0 = inlined_call_operand.vmem [shape: f32[32,32], index: 0, kind: input, shape index: {}]   ;;  %s818_s1 = inlined_call_operand.vmem [shape: f32[32,1], index: 1, kind: input, shape index: {}]   ;;  %s819_s2 = inlined_call_operand.<no memory space> [shape: f32[1], index: 2, kind: input, shape index: {}]   ;;  %s820_s3 = inlined_call_operand.hbm [shape: bf16[32,32], index: 3, kind: output, shape index: {0}]   ;;  %s821_s4 = inlined_call_operand.hbm [shape: f32[1,32], index: 4, kind: output, shape index: {1}]  }
   0x1   :  { %v21_v0 = vld [vmem:[%s817_s0 + $0x10] sm:$0xff]  ;;  %v19_v1 = vld [vmem:[%s817_s0] sm:$0xff]  ;;  %v22_v2 = vld [vmem:[%s817_s0 + $0x18] sm:$0xff] }
   0x2   :  { %v492_v3 = vmul.f32 -1.442695, %v21_v0  ;;  %v490_v4 = vmul.f32 -1.442695, %v19_v1  ;;  %v493_v5 = vmul.f32 -1.442695, %v22_v2 }
   0x3   :  { %v20_v6 = vld [vmem:[%s817_s0 + $0x8] sm:$0xff] }
   0x4   :  { %12 = vsyncpa [#allocation6], 0  ;;  %505 = vpow2.f32 %v492_v3  ;;  %v491_v7 = vmul.f32 -1.442695, %v20_v6  ;;  %vm99_vm1 = vcmask 261120   ;;  %v617_v1 = vmov 32.0  }
   0x5   :  { %507 = vpow2.f32 %v490_v4  ;;  %s476_s8 = sshll.u32 %s821_s4, 4  ;;  %s622_s9 = smov [#allocation3]   ;;  %s477_s8 = int_to_ptr.hbm [resolvable:$true] %s476_s8 }
   0x6   :  { %509 = vpow2.f32 %v493_v5  ;;  %s460_s10 = sshll.u32 %s622_s9, 4  ;;  %s462_s12 = sshll.u32 %s820_s3, 4  ;;  %s461_s10 = int_to_ptr.vmem [resolvable:$true] %s460_s10  ;;  %s463_s12 = int_to_ptr.hbm [resolvable:$true] %s462_s12 }
   0x7   :  { %511 = vpow2.f32 %v491_v7  ;;  %s623_s13 = smov 64   ;;  %s624_s14 = smov 4  }
   0xa   :  { %v506_v8 = vpop.eup %505 }
   0xb   :  { %v508_v9 = vpop.eup %507  ;;  %v37_v10 = vadd.f32 1.0, %v506_v8 }
   0xc   :  { %v510_v11 = vpop.eup %509  ;;  %v35_v12 = vadd.f32 1.0, %v508_v9 }
   0xd   :  { %v512_v13 = vpop.eup %511  ;;  %513 = vrcp.f32 %v37_v10  ;;  %v38_v14 = vadd.f32 1.0, %v510_v11  ;;  %v78_v16 = vand.u32 2147483647, %v37_v10  ;;  %v80_v17 = vand.u32 2147483648, %v37_v10 }
   0xe   :  { %515 = vrcp.f32 %v35_v12  ;;  %v36_v15 = vadd.f32 1.0, %v512_v13  ;;  %v48_v19 = vand.u32 2147483647, %v35_v12  ;;  %v50_v20 = vand.u32 2147483648, %v35_v12 }
   0xf   :  { %517 = vrcp.f32 %v38_v14  ;;  %vm74_vm0 = vweird.f32 %v37_v10  ;;  %vm44_vm2 = vweird.f32 %v35_v12  ;;  %vm662_vm4 = vcmp.eq.f32.partialorder %v78_v16, 8.507059e+37 }
  0x10   :  { %519 = vrcp.f32 %v36_v15  ;;  %v81_v26 = vor.u32 1.1754944e-38, %v80_v17  ;;  %vm666_vm6 = vcmp.eq.f32.partialorder %v48_v19, 8.507059e+37  ;;  %v51_v30 = vor.u32 1.1754944e-38, %v50_v20 }
  0x11   :  { %vm89_vm7 = vweird.f32 %v38_v14  ;;  %v93_v34 = vand.u32 2147483647, %v38_v14  ;;  %v95_v37 = vand.u32 2147483648, %v38_v14  ;;  %vm59_vm9 = vweird.f32 %v36_v15 }
  0x12   :  { %v65_v42 = vand.u32 2147483648, %v36_v15  ;;  %v63_v45 = vand.u32 2147483647, %v36_v15  ;;  %521 = vrcp.f32 %v617_v1 }
  0x13   :  { %v514_v18 = vpop.eup %513  ;;  %vm682_vm13 = vcmp.eq.f32.partialorder %v93_v34, 8.507059e+37  ;;  %v96_v51 = vor.u32 1.1754944e-38, %v95_v37 }
  0x14   :  { %v516_v21 = vpop.eup %515  ;;  %v70_v22 = vmul.f32 %v514_v18, %v37_v10  ;;  %vm75_vm3 = vweird.f32 %v514_v18  ;;  %v66_v56 = vor.u32 1.1754944e-38, %v65_v42 }
  0x15   :  { %v40_v23 = vmul.f32 %v516_v21, %v35_v12  ;;  %v518_v27 = vpop.eup %517  ;;  %vm45_vm5 = vweird.f32 %v516_v21  ;;  %vm671_vm8 = vmor %vm74_vm0, %vm75_vm3  ;;  %vm64_vm0 = vcmp.eq.f32.partialorder %v63_v45, 8.507059e+37 }
  0x16   :  { %v71_v24 = vsub.f32 1.0, %v70_v22  ;;  %v520_v31 = vpop.eup %519  ;;  %v85_v33 = vmul.f32 %v518_v27, %v38_v14  ;;  %vm676_vm10 = vmor %vm44_vm2, %vm45_vm5  ;;  %vm90_vm11 = vweird.f32 %v518_v27 }
  0x17   :  { %v41_v28 = vsub.f32 1.0, %v40_v23  ;;  %v55_v38 = vmul.f32 %v520_v31, %v36_v15  ;;  %vm60_vm12 = vweird.f32 %v520_v31  ;;  %vm91_vm14 = vmor %vm89_vm7, %vm90_vm11 }
  0x18   :  { %v72_v32 = vmul.f32 %v514_v18, %v71_v24  ;;  %v86_v41 = vsub.f32 1.0, %v85_v33  ;;  %vm61_vm15 = vmor %vm59_vm9, %vm60_vm12  ;;  %v522_v2 = vpop.eup %521 }
  0x19   :  { %v42_v36 = vmul.f32 %v516_v21, %v41_v28  ;;  %v56_v44 = vsub.f32 1.0, %v55_v38  ;;  %v113_v3 = vmul.f32 32.0, %v522_v2  ;;  %vm117_vm2 = vweird.f32 %v522_v2 }
  0x1a   :  { %v73_v39 = vadd.f32 %v514_v18, %v72_v32  ;;  %v87_v47 = vmul.f32 %v518_v27, %v86_v41  ;;  %v618_v28 = vmov 31.0  }
  0x1b   :  { %v43_v43 = vadd.f32 %v516_v21, %v42_v36  ;;  %v57_v52 = vmul.f32 %v520_v31, %v56_v44  ;;  %v114_v4 = vsub.f32 1.0, %v113_v3  ;;  %523 = vrcp.f32 %v618_v28  ;;  %v156_v3 = vld [vmem:[%s818_s1 + $0x10] sm:$0xff]  ;;  %v157_v28 = vld [vmem:[%s818_s1 + $0x18] sm:$0xff] }
  0x1c   :  { %v77_v46 = vsel %vm671_vm8, %v514_v18, %v73_v39  ;;  %v88_v55 = vadd.f32 %v518_v27, %v87_v47 }
  0x1d   :  { %v688_v49 = vsel %vm662_vm4, %v81_v26, %v77_v46  ;;  %v47_v50 = vsel %vm676_vm10, %v516_v21, %v43_v43  ;;  %v58_v58 = vadd.f32 %v520_v31, %v57_v52  ;;  %v115_v5 = vmul.f32 %v522_v2, %v114_v4 }
  0x1e   :  { %v106_v53 = vsel %vm99_vm1, %v688_v49, 0.0  ;;  %v697_v54 = vsel %vm666_vm6, %v51_v30, %v47_v50  ;;  %v92_v59 = vsel %vm91_vm14, %v518_v27, %v88_v55  ;;  %v619_v30 = vmov 0  }
  0x1f   :  { %107 = vadd.xlane.f32.xlu1 %v106_v53  ;;  %v100_v57 = vsel %vm99_vm1, %v697_v54, 0.0  ;;  %v704_v60 = vsel %vm682_vm13, %v96_v51, %v92_v59  ;;  %v62_v61 = vsel %vm61_vm15, %v520_v31, %v58_v58  ;;  %v116_v6 = vadd.f32 %v522_v2, %v115_v5  ;;  %502 = vset.pattern.permute.xlu2 %v619_v30 }
  0x20   :  { %101 = vadd.xlane.f32.xlu0 %v100_v57  ;;  %v706_v62 = vsel %vm64_vm0, %v66_v56, %v62_v61  ;;  %v109_v63 = vsel %vm99_vm1, %v704_v60, 0.0  ;;  %504 = vset.pattern.permute.xlu1 %v619_v30 }
  0x21   :  { %v103_v0 = vsel %vm99_vm1, %v706_v62, 0.0  ;;  %v118_v7 = vsel %vm117_vm2, %v522_v2, %v116_v6  ;;  %v524_v29 = vpop.eup %523  ;;  %503 = vset.pattern.permute.xlu0 %v619_v30  ;;  %v154_v6 = vld [vmem:[%s818_s1] sm:$0xff] }
  0x22   :  { %v144_v31 = vmul.f32 31.0, %v524_v29  ;;  %vm148_vm3 = vweird.f32 %v524_v29 }
  0x24   :  { %v145_v32 = vsub.f32 1.0, %v144_v31 }
  0x26   :  { %v146_v33 = vmul.f32 %v524_v29, %v145_v32 }
  0x27   :  { %110 = vadd.xlane.f32.xlu1 %v109_v63 }
  0x28   :  { %104 = vadd.xlane.f32.xlu0 %v103_v0  ;;  %v147_v34 = vadd.f32 %v524_v29, %v146_v33 }
  0x2a   :  { %v149_v35 = vsel %vm148_vm3, %v524_v29, %v147_v34 }
  0x92   :  { %v108_v8 = vpop.xlane.xlu1 %107 }
  0x93   :  { %v712_v9 = vmul.f32 %v118_v7, %v108_v8  ;;  %v102_v10 = vpop.xlane.xlu0 %101 }
  0x94   :  { %v714_v11 = vmul.f32 %v118_v7, %v102_v10 }
  0x95   :  { %v125_v12 = vsub.f32 %v688_v49, %v712_v9 }
  0x96   :  { %v123_v13 = vsub.f32 %v697_v54, %v714_v11 }
  0x97   :  { %v129_v14 = vmul.f32 %v125_v12, %v125_v12 }
  0x98   :  { %v127_v15 = vmul.f32 %v123_v13, %v123_v13 }
  0x99   :  { %v137_v16 = vsel %vm99_vm1, %v129_v14, 0.0 }
  0x9a   :  { %v111_v17 = vpop.xlane.xlu1 %110  ;;  %138 = vadd.xlane.f32.xlu0 %v137_v16  ;;  %v131_v18 = vsel %vm99_vm1, %v127_v15, 0.0 }
  0x9b   :  { %v722_v19 = vmul.f32 %v118_v7, %v111_v17  ;;  %132 = vadd.xlane.f32.xlu2 %v131_v18  ;;  %v105_v20 = vpop.xlane.xlu0 %104 }
  0x9c   :  { %v724_v21 = vmul.f32 %v118_v7, %v105_v20 }
  0x9d   :  { %v126_v22 = vsub.f32 %v704_v60, %v722_v19 }
  0x9e   :  { %v124_v23 = vsub.f32 %v706_v62, %v724_v21 }
  0x9f   :  { %v130_v24 = vmul.f32 %v126_v22, %v126_v22 }
  0xa0   :  { %v128_v25 = vmul.f32 %v124_v23, %v124_v23 }
  0xa1   :  { %v140_v26 = vsel %vm99_vm1, %v130_v24, 0.0 }
  0xa2   :  { %141 = vadd.xlane.f32.xlu1 %v140_v26  ;;  %v134_v27 = vsel %vm99_vm1, %v128_v25, 0.0 }
  0xa3   :  { %135 = vadd.xlane.f32.xlu2 %v134_v27 }
 0x10d   :  { %v139_v36 = vpop.xlane.xlu0 %138 }
 0x10e   :  { %v133_v37 = vpop.xlane.xlu2 %132  ;;  %v152_v38 = vmul.f32 %v149_v35, %v139_v36 }
 0x10f   :  { %v150_v39 = vmul.f32 %v149_v35, %v133_v37 }
 0x110   :  { %525 = vrsqrt.f32 %v152_v38  ;;  %vm189_vm4 = vcmp.eq.f32.partialorder %v152_v38, inf  ;;  %vm191_vm5 = vcmp.eq.f32.partialorder %v152_v38, 0.0  ;;  %v192_v4 = vand.u32 2147483648, %v152_v38 }
 0x111   :  { %527 = vrsqrt.f32 %v150_v39  ;;  %vm165_vm6 = vcmp.eq.f32.partialorder %v150_v39, inf  ;;  %v168_v7 = vand.u32 2147483648, %v150_v39  ;;  %vm167_vm7 = vcmp.eq.f32.partialorder %v150_v39, 0.0 }
 0x115   :  { %v142_v40 = vpop.xlane.xlu1 %141 }
 0x116   :  { %v526_v41 = vpop.eup %525  ;;  %v153_v42 = vmul.f32 %v149_v35, %v142_v40  ;;  %v136_v43 = vpop.xlane.xlu2 %135 }
 0x117   :  { %v528_v44 = vpop.eup %527  ;;  %v151_v45 = vmul.f32 %v149_v35, %v136_v43  ;;  %v183_v46 = vmul.f32 %v526_v41, %v152_v38 }
 0x118   :  { %529 = vrsqrt.f32 %v153_v42  ;;  %v159_v47 = vmul.f32 %v528_v44, %v150_v39  ;;  %vm201_vm8 = vcmp.eq.f32.partialorder %v153_v42, inf  ;;  %v204_v25 = vand.u32 2147483648, %v153_v42 }
 0x119   :  { %531 = vrsqrt.f32 %v151_v45  ;;  %v184_v48 = vmul.f32 %v526_v41, %v183_v46  ;;  %vm203_vm9 = vcmp.eq.f32.partialorder %v153_v42, 0.0  ;;  %vm177_vm10 = vcmp.eq.f32.partialorder %v151_v45, inf }
 0x11a   :  { %v160_v50 = vmul.f32 %v528_v44, %v159_v47  ;;  %v180_v31 = vand.u32 2147483648, %v151_v45  ;;  %vm179_vm11 = vcmp.eq.f32.partialorder %v151_v45, 0.0 }
 0x11b   :  { %v185_v51 = vmul.f32 0.5, %v184_v48 }
 0x11c   :  { %v161_v52 = vmul.f32 0.5, %v160_v50 }
 0x11d   :  { %v186_v53 = vsub.f32 1.5, %v185_v51 }
 0x11e   :  { %v530_v55 = vpop.eup %529  ;;  %v162_v56 = vsub.f32 1.5, %v161_v52 }
 0x11f   :  { %v532_v57 = vpop.eup %531  ;;  %v187_v58 = vmul.f32 %v526_v41, %v186_v53  ;;  %v195_v59 = vmul.f32 %v530_v55, %v153_v42 }
 0x120   :  { %v163_v61 = vmul.f32 %v528_v44, %v162_v56  ;;  %v171_v63 = vmul.f32 %v532_v57, %v151_v45 }
 0x121   :  { %v188_v0 = vmul.f32 %v187_v58, %v152_v38  ;;  %v196_v1 = vmul.f32 %v530_v55, %v195_v59 }
 0x122   :  { %v164_v2 = vmul.f32 %v163_v61, %v150_v39  ;;  %v172_v5 = vmul.f32 %v532_v57, %v171_v63 }
 0x123   :  { %v190_v8 = vsel %vm189_vm4, %v152_v38, %v188_v0  ;;  %v197_v10 = vmul.f32 0.5, %v196_v1  ;;  %v239_v38 = vstv %s819_s2 }
 0x124   :  { %v166_v12 = vsel %vm165_vm6, %v150_v39, %v164_v2  ;;  %v193_v13 = vsel %vm191_vm5, %v192_v4, %v190_v8  ;;  %v173_v14 = vmul.f32 0.5, %v172_v5 }
 0x125   :  { %v169_v15 = vsel %vm167_vm7, %v168_v7, %v166_v12  ;;  %v208_v16 = vmul.f32 %v193_v13, %v156_v3  ;;  %v198_v17 = vsub.f32 1.5, %v197_v10 }
 0x126   :  { %v206_v18 = vmul.f32 %v169_v15, %v154_v6  ;;  %v174_v20 = vsub.f32 1.5, %v173_v14 }
 0x127   :  { %v212_v22 = vadd.f32 %v208_v16, %v712_v9  ;;  %v199_v23 = vmul.f32 %v530_v55, %v198_v17  ;;  %v155_v9 = vld [vmem:[%s818_s1 + $0x8] sm:$0xff]  ;;  %s621_s1 = smov [#allocation5]  }
 0x128   :  { %v210_v24 = vadd.f32 %v206_v18, %v714_v11  ;;  %v175_v26 = vmul.f32 %v532_v57, %v174_v20  ;;  %s474_s2 = sshll.u32 %s621_s1, 4  ;;  %s475_s2 = int_to_ptr.vmem [resolvable:$true] %s474_s2 }
 0x129   :  { %227 = vperm.xlu1 %504, %v212_v22   ;;  %v200_v27 = vmul.f32 %v199_v23, %v153_v42 }
 0x12a   :  { %217 = vperm.xlu2 %502, %v210_v24   ;;  %v176_v29 = vmul.f32 %v175_v26, %v151_v45 }
 0x12b   :  { %v202_v30 = vsel %vm201_vm8, %v153_v42, %v200_v27 }
 0x12c   :  { %v205_v11 = vsel %vm203_vm9, %v204_v25, %v202_v30  ;;  %v178_v32 = vsel %vm177_vm10, %v151_v45, %v176_v29  ;;  %vm437_vm9 = vcmask 253952  }
 0x12d   :  { %v209_v33 = vmul.f32 %v205_v11, %v157_v28  ;;  %v181_v34 = vsel %vm179_vm11, %v180_v31, %v178_v32 }
 0x12e   :  { %v207_v35 = vmul.f32 %v181_v34, %v155_v9 }
 0x12f   :  { %v213_v36 = vadd.f32 %v209_v33, %v722_v19 }
 0x130   :  { %v211_v37 = vadd.f32 %v207_v35, %v724_v21 }
 0x132   :  { %232 = vperm.xlu2 %502, %v213_v36   ;;  %222 = vperm.xlu0 %503, %v211_v37  }
 0x184   :  { %v218_v39 = vpop.permute.xlu2 %217 }
 0x185   :  { %v235_v40 = vsub.f32 %v697_v54, %v218_v39 }
 0x187   :  { %v240_v41 = vmul.f32 %v239_v38, %v235_v40 }
 0x189   :  { %v244_v42 = vmul.f32 1.442695, %v240_v41 }
 0x18b   :  { %533 = vpow2.f32 %v244_v42 }
 0x18c   :  { %v233_v43 = vpop.permute.xlu2 %232 }
 0x18d   :  { %v238_v44 = vsub.f32 %v704_v60, %v233_v43 }
 0x18f   :  { %v243_v45 = vmul.f32 %v239_v38, %v238_v44 }
 0x191   :  { %v534_v46 = vpop.eup %533  ;;  %v250_v19 = vmul.f32 1.442695, %v243_v45 }
 0x192   :  { %535 = vtanh.f32 %v534_v46 }
 0x193   :  { %537 = vpow2.f32 %v250_v19 }
 0x198   :  { %v536_v21 = vpop.eup %535 }
 0x199   :  { %v538_v47 = vpop.eup %537  ;;  %v754_v48 = vmul.f32 %v536_v21, %v697_v54 }
 0x19a   :  { %539 = vtanh.f32 %v538_v47 }
 0x19b   :  { %v228_v50 = vpop.permute.xlu1 %227  ;;  %v260_v51 = vmul.f32 %v754_v48, %v754_v48 }
 0x19c   :  { %v237_v52 = vsub.f32 %v688_v49, %v228_v50 }
 0x19d   :  { %v264_v53 = vsel %vm99_vm1, %v260_v51, 0.0 }
 0x19e   :  { %v242_v55 = vmul.f32 %v239_v38, %v237_v52  ;;  %265 = vadd.xlane.f32.xlu2 %v264_v53 }
 0x1a0   :  { %v540_v56 = vpop.eup %539  ;;  %v248_v57 = vmul.f32 1.442695, %v242_v55 }
 0x1a1   :  { %v761_v58 = vmul.f32 %v540_v56, %v704_v60 }
 0x1a2   :  { %541 = vpow2.f32 %v248_v57 }
 0x1a3   :  { %v263_v54 = vmul.f32 %v761_v58, %v761_v58 }
 0x1a4   :  { %v223_v59 = vpop.permute.xlu0 %222 }
 0x1a5   :  { %v236_v61 = vsub.f32 %v706_v62, %v223_v59  ;;  %v273_v63 = vsel %vm99_vm1, %v263_v54, 0.0 }
 0x1a6   :  { %274 = vadd.xlane.f32.xlu2 %v273_v63 }
 0x1a7   :  { %v241_v0 = vmul.f32 %v239_v38, %v236_v61 }
 0x1a8   :  { %v542_v1 = vpop.eup %541 }
 0x1a9   :  { %543 = vtanh.f32 %v542_v1  ;;  %v246_v2 = vmul.f32 1.442695, %v241_v0 }
 0x1ab   :  { %545 = vpow2.f32 %v246_v2 }
 0x1af   :  { %v544_v3 = vpop.eup %543 }
 0x1b0   :  { %v768_v4 = vmul.f32 %v544_v3, %v688_v49 }
 0x1b1   :  { %v546_v60 = vpop.eup %545 }
 0x1b2   :  { %547 = vtanh.f32 %v546_v60  ;;  %v262_v5 = vmul.f32 %v768_v4, %v768_v4 }
 0x1b4   :  { %v270_v6 = vsel %vm99_vm1, %v262_v5, 0.0 }
 0x1b5   :  { %271 = vadd.xlane.f32.xlu0 %v270_v6 }
 0x1b8   :  { %v548_v7 = vpop.eup %547 }
 0x1b9   :  { %v774_v8 = vmul.f32 %v548_v7, %v706_v62 }
 0x1bb   :  { %v261_v10 = vmul.f32 %v774_v8, %v774_v8 }
 0x1bd   :  { %v267_v12 = vsel %vm99_vm1, %v261_v10, 0.0 }
 0x1be   :  { %268 = vadd.xlane.f32.xlu1 %v267_v12 }
 0x211   :  { %v266_v49 = vpop.xlane.xlu2 %265 }
 0x212   :  { %549 = vrsqrt.f32 %v266_v49  ;;  %vm283_vm12 = vcmp.eq.f32.partialorder %v266_v49, inf  ;;  %v286_v25 = vand.u32 2147483648, %v266_v49  ;;  %vm285_vm13 = vcmp.eq.f32.partialorder %v266_v49, 0.0 }
 0x218   :  { %v550_v13 = vpop.eup %549 }
 0x219   :  { %v277_v14 = vmul.f32 %v550_v13, %v266_v49  ;;  %v275_v15 = vpop.xlane.xlu2 %274 }
 0x21a   :  { %551 = vrsqrt.f32 %v275_v15  ;;  %vm319_vm14 = vcmp.eq.f32.partialorder %v275_v15, inf  ;;  %v322_v40 = vand.u32 2147483648, %v275_v15  ;;  %vm321_vm15 = vcmp.eq.f32.partialorder %v275_v15, 0.0 }
 0x21b   :  { %v278_v16 = vmul.f32 %v550_v13, %v277_v14  ;;  %v620_v14 = vmov 0.0  }
 0x21c   :  { %438 = vst.msk [vmem:[#allocation5] sm:$0x1] %vm437_vm9, %v620_v14 }
 0x21d   :  { %v279_v17 = vmul.f32 0.5, %v278_v16 }
 0x21f   :  { %v280_v18 = vsub.f32 1.5, %v279_v17 }
 0x220   :  { %v552_v20 = vpop.eup %551 }
 0x221   :  { %v281_v22 = vmul.f32 %v550_v13, %v280_v18  ;;  %v313_v23 = vmul.f32 %v552_v20, %v275_v15 }
 0x223   :  { %v282_v62 = vmul.f32 %v281_v22, %v266_v49  ;;  %v314_v24 = vmul.f32 %v552_v20, %v313_v23 }
 0x225   :  { %v284_v26 = vsel %vm283_vm12, %v266_v49, %v282_v62  ;;  %v315_v27 = vmul.f32 0.5, %v314_v24 }
 0x226   :  { %v287_v28 = vsel %vm285_vm13, %v286_v25, %v284_v26 }
 0x227   :  { %v324_v29 = vadd.f32 1e-08, %v287_v28  ;;  %v316_v30 = vsub.f32 1.5, %v315_v27 }
 0x228   :  { %v272_v9 = vpop.xlane.xlu0 %271 }
 0x229   :  { %553 = vrcp.f32 %v324_v29  ;;  %v317_v31 = vmul.f32 %v552_v20, %v316_v30  ;;  %v337_v41 = vand.u32 2147483647, %v324_v29  ;;  %v339_v42 = vand.u32 2147483648, %v324_v29 }
 0x22a   :  { %555 = vrsqrt.f32 %v272_v9  ;;  %vm333_vm2 = vweird.f32 %v324_v29  ;;  %vm307_vm5 = vcmp.eq.f32.partialorder %v272_v9, inf  ;;  %v310_v59 = vand.u32 2147483648, %v272_v9 }
 0x22b   :  { %v318_v32 = vmul.f32 %v317_v31, %v275_v15  ;;  %vm338_vm4 = vcmp.eq.f32.partialorder %v337_v41, 8.507059e+37  ;;  %v340_v47 = vor.u32 1.1754944e-38, %v339_v42  ;;  %vm309_vm6 = vcmp.eq.f32.partialorder %v272_v9, 0.0 }
 0x22d   :  { %v320_v37 = vsel %vm319_vm14, %v275_v15, %v318_v32 }
 0x22e   :  { %v323_v45 = vsel %vm321_vm15, %v322_v40, %v320_v37 }
 0x22f   :  { %v554_v11 = vpop.eup %553  ;;  %v779_v50 = vadd.f32 1e-08, %v323_v45 }
 0x230   :  { %v556_v33 = vpop.eup %555  ;;  %v329_v34 = vmul.f32 %v554_v11, %v324_v29  ;;  %vm334_vm0 = vweird.f32 %v554_v11 }
 0x231   :  { %v301_v35 = vmul.f32 %v556_v33, %v272_v9  ;;  %v269_v36 = vpop.xlane.xlu1 %268  ;;  %vm335_vm3 = vmor %vm333_vm2, %vm334_vm0  ;;  %vm378_vm14 = vweird.f32 %v779_v50  ;;  %v382_v29 = vand.u32 2147483647, %v779_v50  ;;  %v384_v30 = vand.u32 2147483648, %v779_v50 }
 0x232   :  { %557 = vrsqrt.f32 %v269_v36  ;;  %v330_v39 = vsub.f32 1.0, %v329_v34  ;;  %vm295_vm7 = vcmp.eq.f32.partialorder %v269_v36, inf  ;;  %v298_v6 = vand.u32 2147483648, %v269_v36 }
 0x233   :  { %v302_v38 = vmul.f32 %v556_v33, %v301_v35  ;;  %559 = vrcp.f32 %v779_v50  ;;  %vm297_vm8 = vcmp.eq.f32.partialorder %v269_v36, 0.0  ;;  %v385_v37 = vor.u32 1.1754944e-38, %v384_v30 }
 0x234   :  { %v331_v44 = vmul.f32 %v554_v11, %v330_v39 }
 0x235   :  { %v303_v43 = vmul.f32 0.5, %v302_v38 }
 0x236   :  { %v332_v19 = vadd.f32 %v554_v11, %v331_v44 }
 0x237   :  { %v304_v46 = vsub.f32 1.5, %v303_v43 }
 0x238   :  { %v558_v21 = vpop.eup %557  ;;  %v336_v53 = vsel %vm335_vm3, %v554_v11, %v332_v19 }
 0x239   :  { %v305_v51 = vmul.f32 %v556_v33, %v304_v46  ;;  %v289_v52 = vmul.f32 %v558_v21, %v269_v36  ;;  %v341_v55 = vsel %vm338_vm4, %v340_v47, %v336_v53  ;;  %v560_v60 = vpop.eup %559 }
 0x23a   :  { %v782_v54 = vmul.f32 %v341_v55, %v754_v48  ;;  %v374_v10 = vmul.f32 %v560_v60, %v779_v50  ;;  %vm379_vm11 = vweird.f32 %v560_v60  ;;  %v439_v55 = vld [vmem:[#allocation5] sm:$0x1] }
 0x23b   :  { %v306_v56 = vmul.f32 %v305_v51, %v272_v9  ;;  %v290_v57 = vmul.f32 %v558_v21, %v289_v52  ;;  %vm380_vm0 = vmor %vm378_vm14, %vm379_vm11 }
 0x23c   :  { %392 = vxpose.xlu1.b32.start [1/4] (short) (narrow) %v782_v54, 32  ;;  %v375_v16 = vsub.f32 1.0, %v374_v10  ;;  %v440_v43 = vsel %vm99_vm1, %v782_v54, 0.0 }
 0x23d   :  { %v308_v61 = vsel %vm307_vm5, %v272_v9, %v306_v56  ;;  %v291_v63 = vmul.f32 0.5, %v290_v57 }
 0x23e   :  { %v311_v0 = vsel %vm309_vm6, %v310_v59, %v308_v61  ;;  %v376_v18 = vmul.f32 %v560_v60, %v375_v16  ;;  %vm383_vm6 = vcmp.eq.f32.partialorder %v382_v29, 8.507059e+37 }
 0x23f   :  { %v326_v1 = vadd.f32 1e-08, %v311_v0  ;;  %v292_v2 = vsub.f32 1.5, %v291_v63 }
 0x240   :  { %v377_v26 = vadd.f32 %v560_v60, %v376_v18 }
 0x241   :  { %561 = vrcp.f32 %v326_v1  ;;  %v293_v3 = vmul.f32 %v558_v21, %v292_v2  ;;  %v369_v62 = vand.u32 2147483648, %v326_v1  ;;  %vm363_vm12 = vweird.f32 %v326_v1 }
 0x242   :  { %v367_v25 = vand.u32 2147483647, %v326_v1  ;;  %v381_v34 = vsel %vm380_vm0, %v560_v60, %v377_v26 }
 0x243   :  { %v294_v5 = vmul.f32 %v293_v3, %v269_v36  ;;  %v370_v32 = vor.u32 1.1754944e-38, %v369_v62  ;;  %v386_v40 = vsel %vm383_vm6, %v385_v37, %v381_v34 }
 0x244   :  { %vm368_vm3 = vcmp.eq.f32.partialorder %v367_v25, 8.507059e+37  ;;  %v391_v45 = vmul.f32 %v386_v40, %v761_v58 }
 0x245   :  { %v296_v48 = vsel %vm295_vm7, %v269_v36, %v294_v5 }
 0x246   :  { %v299_v7 = vsel %vm297_vm8, %v298_v6, %v296_v48  ;;  %v445_v47 = vsel %vm99_vm1, %v391_v45, 0.0 }
 0x247   :  { %v562_v12 = vpop.eup %561  ;;  %v325_v49 = vadd.f32 1e-08, %v299_v7 }
 0x248   :  { %v359_v13 = vmul.f32 %v562_v12, %v326_v1  ;;  %vm364_vm10 = vweird.f32 %v562_v12 }
 0x249   :  { %563 = vrcp.f32 %v325_v49  ;;  %v354_v27 = vand.u32 2147483648, %v325_v49  ;;  %vm788_vm13 = vmor %vm363_vm12, %vm364_vm10  ;;  %v352_v31 = vand.u32 2147483647, %v325_v49  ;;  %vm348_vm2 = vweird.f32 %v325_v49 }
 0x24a   :  { %v360_v15 = vsub.f32 1.0, %v359_v13 }
 0x24b   :  { %v355_v35 = vor.u32 1.1754944e-38, %v354_v27  ;;  %vm353_vm5 = vcmp.eq.f32.partialorder %v352_v31, 8.507059e+37 }
 0x24c   :  { %v361_v17 = vmul.f32 %v562_v12, %v360_v15 }
 0x24e   :  { %v362_v23 = vadd.f32 %v562_v12, %v361_v17 }
 0x24f   :  { %v564_v20 = vpop.eup %563 }
 0x250   :  { %v344_v22 = vmul.f32 %v564_v20, %v325_v49  ;;  %vm349_vm15 = vweird.f32 %v564_v20  ;;  %v366_v11 = vsel %vm788_vm13, %v562_v12, %v362_v23 }
 0x251   :  { %vm350_vm4 = vmor %vm348_vm2, %vm349_vm15  ;;  %v371_v36 = vsel %vm368_vm3, %v370_v32, %v366_v11 }
 0x252   :  { %v345_v24 = vsub.f32 1.0, %v344_v22  ;;  %v390_v42 = vmul.f32 %v371_v36, %v768_v4 }
 0x254   :  { %v346_v9 = vmul.f32 %v564_v20, %v345_v24  ;;  %v443_v19 = vsel %vm99_vm1, %v390_v42, 0.0 }
 0x256   :  { %v347_v33 = vadd.f32 %v564_v20, %v346_v9 }
 0x258   :  { %v351_v38 = vsel %vm350_vm4, %v564_v20, %v347_v33 }
 0x259   :  { %v356_v39 = vsel %vm353_vm5, %v355_v35, %v351_v38 }
 0x25a   :  { %v389_v41 = vmul.f32 %v356_v39, %v774_v8 }
 0x25c   :  { %v441_v44 = vsel %vm99_vm1, %v389_v41, 0.0  ;;  %393 = vxpose.xlu1.b32.cont [2/4] (short) (narrow) %v389_v41, 32  ;;  %vm428_vm1 = vcmask 257024  }
 0x25d   :  { %v442_v46 = vadd.f32 %v441_v44, %v440_v43 }
 0x25f   :  { %v444_v21 = vadd.f32 %v443_v19, %v442_v46 }
 0x261   :  { %v446_v50 = vadd.f32 %v445_v47, %v444_v21 }
 0x263   :  { %v447_v51 = vrot.slane %v446_v50, 4 }
 0x264   :  { %394 = vxpose.xlu1.b32.cont [3/4] (short) (narrow) %v390_v42, 32 }
 0x265   :  { %v448_v8 = vadd.f32 %v447_v51, %v446_v50 }
 0x267   :  { %v449_v52 = vrot.slane %v448_v8, 2 }
 0x269   :  { %v450_v4 = vadd.f32 %v449_v52, %v448_v8 }
 0x26b   :  { %v451_v53 = vrot.slane %v450_v4, 1 }
 0x26c   :  { %395 = vxpose.xlu1.b32.end [4/4] (short) (narrow) %v391_v45, 32 }
 0x26d   :  { %v452_v56 = vadd.f32 %v451_v53, %v450_v4 }
 0x26f   :  { %v453_v57 = vadd.f32 %v452_v56, %v439_v55 }
 0x271   :  { %455 = vst.msk [vmem:[#allocation5] sm:$0x1] %vm437_vm9, %v453_v57 }
 0x272   :  { %479 = dma.vmem_to_hbm [thread:$0]  %s475_s2, 16, %s477_s8, [#allocation6]  }
 0x2f8   :  { %v408_v58 = vpop.trf.xlu1 }
 0x2f9   :  { %v424_v54 = vpack.c.bf16 %v408_v58, %v408_v58 }
 0x2fb   :  { %429 = vst.msk [vmem:[#allocation3] sm:$0xf] %vm428_vm1, %v424_v54 }
 0x300   :  { %v409_v59 = vpop.trf.xlu1 }
 0x301   :  { %v425_v61 = vpack.c.bf16 %v409_v59, %v409_v59 }
 0x303   :  { %430 = vst.msk [vmem:[#allocation3 + $0x4] sm:$0xf] %vm428_vm1, %v425_v61 }
 0x308   :  { %v410_v63 = vpop.trf.xlu1 }
 0x309   :  { %v426_v0 = vpack.c.bf16 %v410_v63, %v410_v63 }
 0x30b   :  { %431 = vst.msk [vmem:[#allocation3 + $0x8] sm:$0xf] %vm428_vm1, %v426_v0 }
 0x310   :  { %v411_v1 = vpop.trf.xlu1 }
 0x311   :  { %v427_v2 = vpack.c.bf16 %v411_v1, %v411_v1 }
 0x313   :  { %432 = vst.msk [vmem:[#allocation3 + $0xc] sm:$0xf] %vm428_vm1, %v427_v2 }
 0x314   :  { %468 = dma.vmem_to_hbm [thread:$0]  %s461_s10, 256, %s463_s12, [#allocation4], %s623_s13, %s623_s13, %s624_s14  }
 0x315   :  { %613 = dma.done.wait [#allocation4], 256  }
 0x316   :  { %614 = vsyncadd [#allocation4], 4294967040 }
 0x317   :  { %615 = dma.done.wait [#allocation6], 16  }
 0x318   :  { %616 = vsyncadd [#allocation6], 4294967280 }
 0x319   :  { %488 = vsyncpa [#allocation4], 1 }
 0x31a   :  { %489 = vsyncpa [#allocation6], 1 }

</bundles_post_ra>
